<compile_context>
chip_gen: v6e
topology: v6e:2x2x1
jax: 0.10.0
libtpu: 0.0.40
codegen_flags: <defaults>
</compile_context>

<pallas_src>
import functools
from typing import List, Sequence, Tuple

import numpy as np
import jax
import jax.numpy as jnp
from jax.experimental import pallas as pl
from jax.experimental.pallas import tpu as pltpu


# --------------------------- small host-side helpers -------------------------

def _round_up(x: int, m: int) -> int:
    return (x + m - 1) // m * m


def _pick_tile(total: int, cap: int, unit: int = 128) -> int:
    """Largest multiple of `unit` that divides `total` and is <= cap (>= unit)."""
    best = unit
    t = unit
    lim = min(total, max(cap, unit))
    while t <= lim:
        if total % t == 0:
            best = t
        t += unit
    return best


def _shrink_tile(total: int, tile: int, unit: int = 128) -> int:
    """Next smaller multiple-of-`unit` divisor of `total` (or `tile` if none)."""
    if tile <= unit:
        return tile
    return _pick_tile(total, tile - unit, unit)


def _vmem_budget_bytes() -> int:
    """Target ~55% of per-core VMEM; fall back to a v7x-safe 64 MiB if the
    query is unavailable (never request the full physical VMEM)."""
    cap = 64 << 20
    try:
        info = pltpu.get_tpu_info()
        for name in ("vmem_capacity_bytes", "vmem_size_bytes"):
            c = getattr(info, name, None)
            if c:
                cap = int(c)
                break
    except Exception:
        pass
    return int(cap * 0.55)


# --------------------------- kernels -----------------------------------------

def _sum_pool_kernel(s_ref, scale_ref, x_ref, o_ref, acc_ref):
    """sum / mean: S(0/1, input dtype) @ x on the MXU, f32 accumulation over
    the N (contraction) grid axis, per-set f32 scale applied on the VPU."""
    k = pl.program_id(1)

    @pl.when(k == 0)
    def _init():
        acc_ref[...] = jnp.zeros_like(acc_ref)

    acc_ref[...] += jnp.dot(s_ref[...], x_ref[...],
                            preferred_element_type=jnp.float32)

    @pl.when(k == pl.num_programs(1) - 1)
    def _finalize():
        o_ref[...] = (acc_ref[...] * scale_ref[...]).astype(o_ref.dtype)


def _var_pool_kernel(s_ref, inv_n_ref, corr_ref, x_ref, o_ref, sum_ref, sq_ref):
    """var (unbiased, one-pass): accumulate per-set sum and sum-of-squares via
    two MXU matmuls, combine as (E[x^2] - mean^2) * n/(n-1) in f32.
    NOTE: one-pass form can cancel for large-|mean| inputs; size-1 sets give
    NaN (matches torch's unbiased var)."""
    k = pl.program_id(1)

    @pl.when(k == 0)
    def _init():
        sum_ref[...] = jnp.zeros_like(sum_ref)
        sq_ref[...] = jnp.zeros_like(sq_ref)

    x = x_ref[...]
    s = s_ref[...]
    sum_ref[...] += jnp.dot(s, x, preferred_element_type=jnp.float32)
    sq_ref[...] += jnp.dot(s, x * x, preferred_element_type=jnp.float32)

    @pl.when(k == pl.num_programs(1) - 1)
    def _finalize():
        inv_n = inv_n_ref[...]
        mean = sum_ref[...] * inv_n
        var = (sq_ref[...] * inv_n - mean * mean) * corr_ref[...]
        o_ref[...] = var.astype(o_ref.dtype)


def _minmax_pool_kernel(x_ref, o_ref, *, offsets, sizes, num_sets, is_max):
    """max / min over sublane-aligned per-set slices (offsets / sizes are all
    multiples of 8), reduced in the input dtype; results are assembled and
    stored 8 sets at a time as dense, unmasked sublane blocks."""
    num_sets_pad, tile_d = o_ref.shape
    red = jnp.max if is_max else jnp.min
    for g0 in range(0, num_sets_pad, 8):
        rows = []
        for i in range(g0, min(g0 + 8, num_sets)):
            chunk = x_ref[offsets[i]:offsets[i] + sizes[i], :]
            rows.append(red(chunk, axis=0, keepdims=True))
        if len(rows) < 8:  # tail padding rows of the last group
            rows.append(jnp.zeros((8 - len(rows), tile_d), rows[0].dtype))
        o_ref[g0:g0 + 8, :] = jnp.concatenate(rows, axis=0).astype(o_ref.dtype)


# --------------------------- pallas_call builders ----------------------------

def _matmul_pool(x2d, sizes, offsets, mode, num_sets_pad, d128, budget):
    """sum / mean / var via the selection-matrix matmul path."""
    n, d = x2d.shape
    x_dtype = x2d.dtype
    x_item = int(x2d.dtype.itemsize)
    n_accs = 2 if mode == "var" else 1
    n_scales = 2 if mode == "var" else 1

    big_vmem = budget >= (48 << 20)          # 128 MiB parts (v5e/v6e) vs v7x
    cap_d = 2048 if big_vmem else 512
    cap_n = 1024 if big_vmem else 512

    tile_d = _pick_tile(d128, cap_d)
    if n <= 128:
        n_pad = _round_up(n, 8)
        tile_n = n_pad
        n_tileable = False
    else:
        n_pad = _round_up(n, 128)
        tile_n = _pick_tile(n_pad, cap_n)
        n_tileable = True

    def vmem_need(tn, td):
        return (2 * tn * td * x_item                  # x block (double-buffered)
                + 2 * num_sets_pad * tn * x_item      # S block (double-buffered)
                + 2 * num_sets_pad * td * x_item      # out block
                + 2 * num_sets_pad * 4 * n_scales     # f32 scale columns
                + num_sets_pad * td * 4 * n_accs)     # f32 accumulators (scratch)

    # 1) fit inside the per-generation VMEM budget
    while vmem_need(tile_n, tile_d) > budget:
        if n_tileable and tile_n > 128:
            tile_n = _shrink_tile(n_pad, tile_n)
        elif tile_d > 128:
            tile_d = _shrink_tile(d128, tile_d)
        else:
            break
    # 2) aim for >= 4 grid steps (pipeline overlap + both v7x TensorCores)
    while (d128 // tile_d) * (n_pad // tile_n) < 4:
        if tile_d > 128:
            tile_d = _shrink_tile(d128, tile_d)
        elif n_tileable and tile_n > 128:
            tile_n = _shrink_tile(n_pad, tile_n)
        else:
            break

    need = vmem_need(tile_n, tile_d)
    vmem_limit = int(max(16 << 20, min(2 * need, budget), need + (2 << 20)))

    # host-side zero padding (S has zero columns / rows there, so exact)
    xp = x2d
    if n_pad != n or d128 != d:
        xp = jnp.pad(x2d, ((0, n_pad - n), (0, d128 - d)))

    # 0/1 selection matrix in the INPUT dtype (exact even in bf16); all
    # normalisation factors live in f32 scale columns applied on the VPU.
    # TODO(synk): for very large N / many sets build S block-diagonally per N
    # tile instead of materialising the dense [num_sets_pad, N] matrix in HBM.
    s_np = np.zeros((num_sets_pad, n_pad), np.float32)
    for i, (off, sz) in enumerate(zip(offsets, sizes)):
        s_np[i, off:off + sz] = 1.0
    s_mat = jnp.asarray(s_np, dtype=x_dtype)

    grid = (d128 // tile_d, n_pad // tile_n)
    s_spec = pl.BlockSpec((num_sets_pad, tile_n), lambda j, k: (0, k))
    col_spec = pl.BlockSpec((num_sets_pad, 1), lambda j, k: (0, 0))
    x_spec = pl.BlockSpec((tile_n, tile_d), lambda j, k: (k, j))
    out_spec = pl.BlockSpec((num_sets_pad, tile_d), lambda j, k: (0, j))
    out_shape = jax.ShapeDtypeStruct((num_sets_pad, d128), x_dtype)
    cparams = pltpu.CompilerParams(
        dimension_semantics=("parallel", "arbitrary"),
        vmem_limit_bytes=vmem_limit)

    if mode == "var":
        inv_n = np.zeros((num_sets_pad, 1), np.float32)
        corr = np.zeros((num_sets_pad, 1), np.float32)
        for i, sz in enumerate(sizes):
            inv_n[i, 0] = 1.0 / float(sz)
            corr[i, 0] = float(sz) / float(sz - 1) if sz > 1 else np.nan
        return pl.pallas_call(
            _var_pool_kernel,
            out_shape=out_shape,
            grid=grid,
            in_specs=[s_spec, col_spec, col_spec, x_spec],
            out_specs=out_spec,
            scratch_shapes=[pltpu.VMEM((num_sets_pad, tile_d), jnp.float32),
                            pltpu.VMEM((num_sets_pad, tile_d), jnp.float32)],
            compiler_params=cparams,
        )(s_mat, jnp.asarray(inv_n), jnp.asarray(corr), xp)

    scale = np.zeros((num_sets_pad, 1), np.float32)
    for i, sz in enumerate(sizes):
        scale[i, 0] = 1.0 if mode == "sum" else 1.0 / float(sz)
    return pl.pallas_call(
        _sum_pool_kernel,
        out_shape=out_shape,
        grid=grid,
        in_specs=[s_spec, col_spec, x_spec],
        out_specs=out_spec,
        scratch_shapes=[pltpu.VMEM((num_sets_pad, tile_d), jnp.float32)],
        compiler_params=cparams,
    )(s_mat, jnp.asarray(scale), xp)


def _minmax_pool(x2d, sizes, offsets, mode, num_sets_pad, d128, budget):
    """max / min via sublane-aligned static per-set slices."""
    n, d = x2d.shape
    num_sets = len(sizes)
    x_dtype = x2d.dtype
    x_item = int(x2d.dtype.itemsize)
    is_max = (mode == "max")

    # Sublane-align every set: pad each set to a multiple of 8 rows with the
    # reduction identity so in-kernel slices start on sublane boundaries.
    pad_sizes = [_round_up(s, 8) for s in sizes]
    pad_offsets = np.concatenate([[0], np.cumsum(pad_sizes)[:-1]]).astype(np.int64)
    n_mm = int(np.sum(pad_sizes))

    big_vmem = budget >= (48 << 20)
    cap_d = 2048 if big_vmem else 512
    tile_d = _pick_tile(d128, cap_d)

    def vmem_need(td):
        return 2 * n_mm * td * x_item + 2 * num_sets_pad * td * x_item

    while vmem_need(tile_d) > budget and tile_d > 128:
        tile_d = _shrink_tile(d128, tile_d)
    while (d128 // tile_d) < 4 and tile_d > 128:
        tile_d = _shrink_tile(d128, tile_d)
    # TODO(synk): also tile the row (N) axis with a running min/max scratch for
    # very large row counts; today the whole aligned column block sits in VMEM.

    need = vmem_need(tile_d)
    vmem_limit = int(max(16 << 20, min(2 * need, budget), need + (2 << 20)))

    xd = x2d if d128 == d else jnp.pad(x2d, ((0, 0), (0, d128 - d)))
    if n_mm == n:                      # all sets already sublane-aligned
        x_mm = xd
    else:                              # one-shot layout pass: gather + fill
        gather_idx = np.zeros(n_mm, np.int32)
        valid = np.zeros((n_mm, 1), np.bool_)
        for off, poff, sz in zip(offsets, pad_offsets, sizes):
            gather_idx[poff:poff + sz] = np.arange(off, off + sz)
            valid[poff:poff + sz, 0] = True
        fill = jnp.asarray(-np.inf if is_max else np.inf, dtype=x_dtype)
        x_mm = jnp.where(jnp.asarray(valid), xd[jnp.asarray(gather_idx)], fill)

    kernel = functools.partial(
        _minmax_pool_kernel,
        offsets=tuple(int(o) for o in pad_offsets),
        sizes=tuple(int(s) for s in pad_sizes),
        num_sets=num_sets,
        is_max=is_max)

    grid = (d128 // tile_d,)
    return pl.pallas_call(
        kernel,
        out_shape=jax.ShapeDtypeStruct((num_sets_pad, d128), x_dtype),
        grid=grid,
        in_specs=[pl.BlockSpec((n_mm, tile_d), lambda j: (0, j))],
        out_specs=pl.BlockSpec((num_sets_pad, tile_d), lambda j: (0, j)),
        compiler_params=pltpu.CompilerParams(
            dimension_semantics=("parallel",),
            vmem_limit_bytes=vmem_limit),
    )(x_mm)


def _pallas_set_pool(x2d: jax.Array, index: Sequence[int], mode: str) -> jax.Array:
    """x2d: [N, D] float array.  Returns [num_sets, D] pooled rows in x2d.dtype."""
    n, d = x2d.shape
    num_sets = len(index)
    sizes = [int(s) for s in index]
    offsets = np.concatenate([[0], np.cumsum(sizes)[:-1]]).astype(np.int64)

    num_sets_pad = _round_up(max(num_sets, 1), 8)
    d128 = _round_up(d, 128)
    budget = _vmem_budget_bytes()

    if mode in ("sum", "avg", "mean", "var"):
        out = _matmul_pool(x2d, sizes, offsets, mode, num_sets_pad, d128, budget)
    elif mode in ("max", "min"):
        out = _minmax_pool(x2d, sizes, offsets, mode, num_sets_pad, d128, budget)
    else:
        raise AssertionError(f"unknown pooling mode: {mode}")

    if out.shape != (num_sets, d):
        out = out[:num_sets, :d]
    return out


# --------------------------- module wrapper ----------------------------------

class SetPooling:
    """JAX/Pallas equivalent of the PyTorch SetPooling module (forward only)."""

    def __init__(self, mode: str, keep_shape: bool = False) -> None:
        self.mode = mode
        self.keep_shape = keep_shape

    def __call__(self, batch: jax.Array, index: List[int]) -> Tuple[jax.Array, List[int]]:
        index = [int(i) for i in index]
        assert int(np.sum(index)) == batch.shape[0], "index must partition dim 0"
        assert all(i >= 1 for i in index), "set sizes must be >= 1"
        n = batch.shape[0]
        feat_shape = batch.shape[1:]
        d = int(np.prod(feat_shape)) if feat_shape else 1

        x = batch
        if not jnp.issubdtype(x.dtype, jnp.floating):
            x = x.astype(jnp.float32)
        x2d = x.reshape(n, d)
        pooled = _pallas_set_pool(x2d, index, self.mode)        # [num_sets, d]
        if pooled.dtype != batch.dtype:
            pooled = pooled.astype(batch.dtype)

        if self.keep_shape:
            gather_idx = np.repeat(np.arange(len(index)), index)  # static
            output = pooled[gather_idx].reshape((n,) + feat_shape)
            new_index = list(index)
        else:
            output = pooled.reshape((len(index),) + feat_shape)
            new_index = [1] * len(index)
        return output, new_index


# --------------------------- reference & test --------------------------------

def _reference_set_pool(batch, index, mode, keep_shape):
    x = jnp.asarray(batch, dtype=jnp.float32)
    chunks = []
    off = 0
    for sz in index:
        c = x[off:off + sz]
        off += sz
        if mode in ("avg", "mean"):
            p = jnp.mean(c, axis=0, keepdims=True)
        elif mode == "sum":
            p = jnp.sum(c, axis=0, keepdims=True)
        elif mode == "max":
            p = jnp.max(c, axis=0, keepdims=True)
        elif mode == "min":
            p = jnp.min(c, axis=0, keepdims=True)
        elif mode == "var":
            p = jnp.var(c, axis=0, keepdims=True, ddof=1)
        else:
            raise AssertionError
        if keep_shape:
            p = jnp.broadcast_to(p, (sz,) + p.shape[1:])
        chunks.append(p)
    return jnp.concatenate(chunks, axis=0)


if __name__ == "__main__":
    key = jax.random.PRNGKey(0)
    ok = True

    # config 1: lane-aligned features; config 2: unaligned (exercises padding)
    configs = [
        ([3, 2, 4], (8, 32)),     # N=9,  D=256
        ([2, 5, 3, 2], (5, 7)),   # N=12, D=35 -> padded to 128
    ]
    modes = ["mean", "sum", "max", "min", "var"]

    for index, feat in configs:
        N = int(np.sum(index))
        key, sub = jax.random.split(key)
        batch = jax.random.normal(sub, (N,) + feat, dtype=jnp.float32)
        # quantise to the bf16 grid so reductions are exactly representable
        batch = batch.astype(jnp.bfloat16).astype(jnp.float32)

        for mode in modes:
            module = SetPooling(mode, keep_shape=False)
            out, new_index = module(batch, index)
            out = jax.block_until_ready(out)
            ref = _reference_set_pool(batch, index, mode, keep_shape=False)
            assert new_index == [1] * len(index)
            tol = 5e-3 if mode == "var" else 1e-4
            if not np.allclose(np.asarray(out), np.asarray(ref), rtol=tol, atol=tol):
                ok = False
                print(f"MISMATCH index={index} feat={feat} mode={mode}")

    # keep_shape=True path (static broadcast back to per-row layout)
    index, feat = configs[0]
    key, sub = jax.random.split(key)
    batch = jax.random.normal(sub, (int(np.sum(index)),) + feat, dtype=jnp.float32)
    batch = batch.astype(jnp.bfloat16).astype(jnp.float32)
    out, new_index = SetPooling("mean", keep_shape=True)(batch, index)
    out = jax.block_until_ready(out)
    ref = _reference_set_pool(batch, index, "mean", keep_shape=True)
    if new_index != index or not np.allclose(np.asarray(out), np.asarray(ref),
                                             rtol=1e-4, atol=1e-4):
        ok = False
        print("MISMATCH keep_shape=True")

    # bf16-input smoke test (native bf16 MXU path with f32 scale column)
    key, sub = jax.random.split(key)
    bbf = jax.random.normal(sub, (12, 4, 32), dtype=jnp.float32).astype(jnp.bfloat16)
    out_bf, _ = SetPooling("mean")(bbf, [5, 7])
    out_bf = jax.block_until_ready(out_bf)
    ref_bf = _reference_set_pool(bbf, [5, 7], "mean", keep_shape=False)
    if not np.allclose(np.asarray(jnp.asarray(out_bf, jnp.float32)),
                       np.asarray(ref_bf), rtol=2e-2, atol=2e-2):
        ok = False
        print("MISMATCH bf16 mean")

    if ok:
        print("KERNEL_OK")
</pallas_src>

<mosaic_0001>
module attributes {stable_mosaic.version = 11 : i64} {
  func.func @_sum_pool_kernel(%arg0: i32, %arg1: i32, %arg2: memref<8x16xf32, #tpu.memory_space<vmem>>, %arg3: memref<8x1xf32, #tpu.memory_space<vmem>>, %arg4: memref<16x128xf32, #tpu.memory_space<vmem>>, %arg5: memref<8x128xf32, #tpu.memory_space<vmem>>, %arg6: memref<8x128xf32, #tpu.memory_space<vmem>>) attributes {dimension_semantics = [#tpu.dimension_semantics<parallel>, #tpu.dimension_semantics<arbitrary>], iteration_bounds = array<i64: 2, 1>, scalar_prefetch = 0 : i64, scratch_operands = 1 : i64, tpu.core_type = #tpu.core_type<tc>, window_params = [{transform_indices = @transform_0, window_bounds = array<i64: 8, 16>}, {pipeline_mode = #tpu.pipeline_mode<synchronous>, transform_indices = @transform_1, window_bounds = array<i64: 8, 1>}, {transform_indices = @transform_2, window_bounds = array<i64: 16, 128>}, {transform_indices = @transform_3, window_bounds = array<i64: 8, 128>}]} {
    %c0_i32 = arith.constant 0 : i32
    %0 = arith.cmpi eq, %arg1, %c0_i32 : i32
    %1 = arith.extui %0 : i1 to i32
    %c0_i32_0 = arith.constant 0 : i32
    %2 = arith.cmpi ne, %1, %c0_i32_0 : i32
    scf.if %2 {
      %cst_10 = arith.constant 0.000000e+00 : f32
      %12 = vector.broadcast %cst_10 : f32 to vector<8x128xf32>
      %c0_11 = arith.constant 0 : index
      %c0_12 = arith.constant 0 : index
      %13 = vector.load %arg6[%c0_11, %c0_12] : memref<8x128xf32, #tpu.memory_space<vmem>>, vector<8x128xf32>
      tpu.vector_store %arg6[%c0_11, %c0_12], %12 {strides = array<i32>} : memref<8x128xf32, #tpu.memory_space<vmem>>, vector<8x128xf32>,
    } else {
    }
    %c0 = arith.constant 0 : index
    %c0_1 = arith.constant 0 : index
    %3 = vector.load %arg6[%c0, %c0_1] : memref<8x128xf32, #tpu.memory_space<vmem>>, vector<8x128xf32>
    %c0_2 = arith.constant 0 : index
    %c0_3 = arith.constant 0 : index
    %4 = vector.load %arg2[%c0_2, %c0_3] : memref<8x16xf32, #tpu.memory_space<vmem>>, vector<8x16xf32>
    %c0_4 = arith.constant 0 : index
    %c0_5 = arith.constant 0 : index
    %5 = vector.load %arg4[%c0_4, %c0_5] : memref<16x128xf32, #tpu.memory_space<vmem>>, vector<16x128xf32>
    %cst = arith.constant dense<0.000000e+00> : vector<8x128xf32>
    %6 = tpu.matmul %4, %5, %cst {dimension_numbers = #tpu.dot_dimension_numbers<[1], [0], [0], [1], [0, 0, 1, 1], [], []>} : vector<8x16xf32>, vector<16x128xf32>, vector<8x128xf32> -> vector<8x128xf32>
    %7 = arith.addf %3, %6 : vector<8x128xf32>
    %c0_6 = arith.constant 0 : index
    %c0_7 = arith.constant 0 : index
    %8 = vector.load %arg6[%c0_6, %c0_7] : memref<8x128xf32, #tpu.memory_space<vmem>>, vector<8x128xf32>
    tpu.vector_store %arg6[%c0_6, %c0_7], %7 {strides = array<i32>} : memref<8x128xf32, #tpu.memory_space<vmem>>, vector<8x128xf32>,
    %c0_i32_8 = arith.constant 0 : i32
    %9 = arith.cmpi eq, %arg1, %c0_i32_8 : i32
    %10 = arith.extui %9 : i1 to i32
    %c0_i32_9 = arith.constant 0 : i32
    %11 = arith.cmpi ne, %10, %c0_i32_9 : i32
    scf.if %11 {
      %c0_10 = arith.constant 0 : index
      %c0_11 = arith.constant 0 : index
      %12 = vector.load %arg6[%c0_10, %c0_11] : memref<8x128xf32, #tpu.memory_space<vmem>>, vector<8x128xf32>
      %c0_12 = arith.constant 0 : index
      %c0_13 = arith.constant 0 : index
      %13 = vector.load %arg3[%c0_12, %c0_13] : memref<8x1xf32, #tpu.memory_space<vmem>>, vector<8x1xf32>
      %14 = vector.broadcast %13 : vector<8x1xf32> to vector<8x128xf32>
      %15 = arith.mulf %12, %14 : vector<8x128xf32>
      %c0_14 = arith.constant 0 : index
      %c0_15 = arith.constant 0 : index
      %16 = vector.load %arg5[%c0_14, %c0_15] : memref<8x128xf32, #tpu.memory_space<vmem>>, vector<8x128xf32>
      tpu.vector_store %arg5[%c0_14, %c0_15], %15 {strides = array<i32>} : memref<8x128xf32, #tpu.memory_space<vmem>>, vector<8x128xf32>,
    } else {
    }
    return
  }
  func.func @transform_0(%arg0: i32, %arg1: i32) -> (i32, i32) {
    %c0_i32 = arith.constant 0 : i32
    %c0_i32_0 = arith.constant 0 : i32
    return %c0_i32, %arg1 : i32, i32
  }
  func.func @transform_1(%arg0: i32, %arg1: i32) -> (i32, i32) {
    %c0_i32 = arith.constant 0 : i32
    %c0_i32_0 = arith.constant 0 : i32
    %c0_i32_1 = arith.constant 0 : i32
    return %c0_i32, %c0_i32_0 : i32, i32
  }
  func.func @transform_2(%arg0: i32, %arg1: i32) -> (i32, i32) {
    %c0_i32 = arith.constant 0 : i32
    return %arg1, %arg0 : i32, i32
  }
  func.func @transform_3(%arg0: i32, %arg1: i32) -> (i32, i32) {
    %c0_i32 = arith.constant 0 : i32
    %c0_i32_0 = arith.constant 0 : i32
    return %c0_i32, %arg0 : i32, i32
  }
}

</mosaic_0001>

<bundles_post_ra>
// kernel: tpu_custom_call.1
= control target key start
LH: loop header
LB: loop body
LE: loop exit
PB: predicated region body
PF: predicated region fallthrough
CT: control target
= control target key end

     0   :  { %8 = vsyncpa [#allocation4], 0  ;;  %s804_s0 = inlined_call_operand.vmem [shape: f32[8,16], index: 0, kind: input, shape index: {}]   ;;  %s805_s1 = inlined_call_operand.vmem [shape: f32[8,1], index: 1, kind: input, shape index: {}]   ;;  %s806_s2 = inlined_call_operand.hbm [shape: f32[16,256], index: 2, kind: input, shape index: {}]   ;;  %s807_s3 = inlined_call_operand.hbm [shape: f32[8,256], index: 3, kind: output, shape index: {}]  }
   0x1   :  { %10 = vsyncpa [#allocation4 + $0x1], 0 }
   0x2   :  { %11 = vsyncpa [#allocation5], 0 }
   0x3   :  { %13 = vsyncpa [#allocation5 + $0x1], 0  ;;  %s661_s12 = smov 0   ;;  %s663_s13 = smov 0  }
   0x4   :  { %s665_s14 = smov 0   ;;  %s667_s15 = smov 0  }
   0x5   :  { %s669_s16 = smov 0   ;;  %s671_s17 = smov 0  }
   0x6 LB: > { %s429_s18 = sadd.s32 4294967295, %s631_s17   ;;  %s430_s19 = sadd.s32 4294967294, %s631_s17   ;;  %s631_s17 = sphi %s671_s17, %s19_s17   ;;  %s627_s16 = sphi %s669_s16, %s818_s16   ;;  %s623_s15 = sphi %s667_s15, %s817_s15   ;;  %s619_s14 = sphi %s665_s14, %s816_s14   ;;  %s615_s13 = sphi %s663_s13, %s815_s13   ;;  %s611_s12 = sphi %s661_s12, %s814_s12  }
   0x7   : > { %s31_s20 = sadd.s32 1, %s627_s16  ;;  %s87_s21 = sadd.s32 1, %s619_s14 }
   0x8   : > { %p33_p0 = scmp.ge.s32.totalorder %s31_s20, 2  ;;  %p94_p1 = scmp.ne.s32.totalorder %s619_s14, %s615_s13 }
   0x9   : > { %p95_p2 = scmp.eq.s32.totalorder %s631_s17, 0  ;;  %p100_p3 = scmp.ne.s32.totalorder %s615_s13, %s611_s12 }
   0xa   : > { %s820_s20 = smov (%p33_p0, %s31_s20), 0  ;;  %p101_p5 = scmp.eq.s32.totalorder %s429_s18, 0 }
   0xb   : > { %p702_p4 = por %p95_p2, %p94_p1  ;;  %s83_s23 = ssub.s32 %s627_s16, %s820_s20 }
   0xc   : > { %p124_p6 = scmp.eq.s32.totalorder %s429_s18, 1  ;;  %p85_p7 = scmp.eq.s32.totalorder %s83_s23, 0 }
   0xd   : > { %p708_p8 = por %p101_p5, %p100_p3  ;;  %p130_p10 = scmp.eq.s32.totalorder %s430_s19, 1 }
   0xe   : > { %p712_p9 = por %p124_p6, %p94_p1  ;;  %p466_p13 = scmp.lt.s32.totalorder %s631_s17, 2 }
   0xf   : > { %s717_s26 = scalar_select %p85_p7, %s619_s14, %s87_s21  }
  0x10   : > { %p719_p11 = por %p130_p10, %p100_p3  ;;  %s160_s28 = sand.u32 1, %s619_s14  }
  0x11   : > { %s434_s29 = sshll.u32 %s160_s28, 4  ;;  %s435_s30 = sshll.u32 %s627_s16, 7 }
  0x12   : > { %s172_s6 = scalar_lea.hbm %s806_s2, %s435_s30  ;;  %s164_s7 = scalar_lea.vmem [#allocation3], %s434_s29 }
  0x13   : > { %s173_s8 = sshll.u32 %s164_s7, 4  ;;  %p732_p0 = pnand %p466_p13, %p702_p4  ;;  %s174_s8 = int_to_ptr.vmem [resolvable:$true] %s173_s8 }
  0x14   : > { %s161_s10 = scalar_lea.sflag [#allocation4], %s160_s28  ;;  %s536_s11 = scalar_lea.vmem %s174_s8, 256 }
  0x15   : > { %p525_p1 = pneg %p732_p0  ;;  %p537_p2 = scmp.ne.s32.totalorder %s174_s8, %s536_s11 }
  0x16   : > { %s633_s18 = smov [#allocation3]  }
  0x17   : > { %p539_p3 = pnand %p537_p2, %p525_p1  ;;  %s541_s19 = sshll.u32 %s633_s18, 4  ;;  %s542_s19 = int_to_ptr.vmem [resolvable:$false] %s541_s19 }
  0x18   : > { %s543_s21 = scalar_lea.vmem %s542_s19, 512  ;;  %p544_p6 = scmp.lt.s32.totalorder %s174_s8, %s542_s19 }
  0x19   : > { %p540_p5 = pneg %p539_p3  ;;  %p545_p7 = scmp.lt.s32.totalorder %s543_s21, %s536_s11 }
  0x1b   : > { %p546_p10 = por %p545_p7, %p544_p6 }
  0x1d   : > { %p547_p12 = pnand %p546_p10, %p540_p5 }
  0x1f   : > { %550 = shalt.err (!%p547_p12)
}
  0x20   : > { %s634_s22 = smov 256   ;;  %s635_s23 = smov 128  }
  0x21   : > { %s636_s28 = smov 8   ;;  %p436_p4 = scmp.ge.s32.totalorder %s631_s17, 1 }
  0x22   : > { %461 = dma.hbm_to_vmem [thread:$0]  (!%p732_p0), %s172_s6, 256, %s174_s8, %s161_s10, %s634_s22, %s635_s23, %s636_s28  }
  0x23   : > { %p181_p13 = scmp.lt.s32.totalorder %s631_s17, 3 }
  0x25   : > { %p182_p1 = pnand %p436_p4, %p181_p13 }
  0x26   : > { %s743_s29 = sand.u32 (!%p182_p1), 1, %s615_s13  }
  0x27   : > { %185 = sbr.rel (%p182_p1) target bundleno = 258 (0x102), region = 32  ;;  %s437_s30 = sshll.u32 (!%p182_p1), %s743_s29, 4 }
  0x28   : > { %s188_s4 = scalar_lea.sflag (!%p182_p1), [#allocation4], %s743_s29  ;;  %s191_s5 = scalar_lea.vmem (!%p182_p1), [#allocation3], %s437_s30 }
  0x2c   : > { %602 = dma.done.wait (%p708_p8), %s188_s4, 256  }
  0x2d   : > { %604 = vsyncadd (%p708_p8), %s188_s4, 4294967040  ;;  %v637_v0 = vmov 0.0   ;;  %vm638_vm0 = vmmov 0   ;;  %v639_v1 = vmov 0   ;;  %v231_v2 = vld [vmem:[%s191_s5 + $0x8] sm:$0xff]  ;;  %v230_v3 = vld [vmem:[%s191_s5] sm:$0xff] }
  0x2e   : > { %447 = vmatprep.subr.mxu0 %v637_v0  ;;  %451 = vmatprep.mubr.msk.f32.mxu0 %vm638_vm0, %v637_v0  ;;  %v229_v4 = vld [vmem:[%s804_s0] sm:$0xff]  ;;  %vm232_vm1 = vcmask 130048   ;;  %s438_s24 = sshll.u32 %s743_s29, 3  ;;  %s441_s10 = sshll.u32 %s623_s15, 7 }
  0x2f   : > { %522 = vset.pattern.permute.xlu0 %v639_v1  ;;  %448 = vmatpush3.msra.mxu0 %v231_v2  ;;  %v312_v5 = vld [vmem:[%s805_s1] sm:$0xff]  ;;  %s217_s11 = scalar_lea.vmem [#allocation6], %s438_s24  ;;  %s762_s22 = scalar_lea.hbm %s807_s3, %s441_s10 }
  0x30   : > { %449 = vmatprep.subr.mxu0 %v637_v0  ;;  %315 = vperm.xlu0 %522, %v312_v5   ;;  %s334_s18 = sshll.u32 %s217_s11, 4  ;;  %s321_s23 = scalar_lea.sflag [#allocation5], %s743_s29  ;;  %s335_s18 = int_to_ptr.vmem [resolvable:$true] %s334_s18 }
  0x31   : > { %450 = vmatpush3.msra.mxu0 %v230_v3  ;;  %s551_s28 = scalar_lea.vmem %s335_s18, 128  ;;  %s640_s30 = smov [#allocation6]  }
  0x32   : > { %452 = vmatmul.mubr.msk.f32.vlgmr.msra.gmra.mxu0 %vm232_vm1, %v229_v4  ;;  %p552_p8 = scmp.ne.s32.totalorder %s335_s18, %s551_s28  ;;  %s555_s15 = sshll.u32 %s640_s30, 4  ;;  %s556_s15 = int_to_ptr.vmem [resolvable:$false] %s555_s15 }
  0x33   : > { %s557_s4 = scalar_lea.vmem %s556_s15, 256  ;;  %p558_p2 = scmp.lt.s32.totalorder %s335_s18, %s556_s15 }
  0x34   : > { %p553_p12 = pnand %p552_p8, %p712_p9  ;;  %p559_p3 = scmp.lt.s32.totalorder %s557_s4, %s551_s28 }
  0x36   : > { %p554_p0 = pneg %p553_p12  ;;  %p560_p5 = por %p559_p3, %p558_p2 }
  0x38   : > { %p561_p6 = pnand %p560_p5, %p554_p0 }
  0xab   : > { %v316_v6 = vpop.permute.xlu0 %315 }
  0xf2   : > { %v302_v7 = vpop.f32.mrf.mxu0 }
  0xf3   : > { %v318_v8 = vmul.f32 %v316_v6, %v302_v7 }
  0xf4   : > { %v453_v9 = vpop.f32.mrf.mxu0 }
  0xf5   : > { %319 = vst [vmem:[%s217_s11] sm:$0xff] %v318_v8 }
  0xf6   : > { %564 = shalt.err (!%p561_p6)
}
  0xf7   : > { %s565_s5 = scalar_lea.hbm %s762_s22, 128  ;;  %s569_s7 = scalar_lea.hbm %s807_s3, 256 }
  0xf8   : > { %p566_p7 = scmp.ne.s32.totalorder %s762_s22, %s565_s5  ;;  %p570_p13 = scmp.lt.s32.totalorder %s762_s22, %s807_s3 }
  0xf9   : > { %p571_p1 = scmp.lt.s32.totalorder %s569_s7, %s565_s5 }
  0xfa   : > { %p567_p10 = pnand %p566_p7, %p712_p9 }
  0xfb   : > { %p572_p8 = por %p571_p1, %p570_p13 }
  0xfc   : > { %p568_p4 = pneg %p567_p10 }
  0xfe   : > { %p573_p12 = pnand %p572_p8, %p568_p4 }
 0x100   : > { %576 = shalt.err (!%p573_p12)
}
 0x101   : > { %456 = dma.vmem_to_hbm [thread:$0]  (%p712_p9), %s335_s18, 128, %s762_s22, %s321_s23  }
 0x102 PF: > { %s346_s24 = sand.u32 1, %s611_s12   ;;  %p813_p0 = scmp.ge.s32.totalorder %s631_s17, 2 }
 0x103   : > { %s347_s10 = scalar_lea.sflag [#allocation5], %s346_s24 }
 0x104   : > { %p463_p2 = pnand %p813_p0, %p719_p11 }
 0x106   : > { %p464_p3 = pneg %p463_p2 }
 0x108   : > { %606 = dma.done.wait (%p464_p3), %s347_s10, 128  }
 0x109   : > { %608 = vsyncadd (%p464_p3), %s347_s10, 4294967168  ;;  %s19_s17 = sadd.s32 1, %s631_s17   ;;  %s814_s12 = smov %s615_s13 }
 0x10a   : > { %p16_p5 = scmp.ge.s32.totalorder %s19_s17, 4   ;;  %s815_s13 = smov %s619_s14 }
 0x10b   : > { %s816_s14 = smov %s717_s26  ;;  %s817_s15 = smov %s627_s16 }
 0x10c   : > { %s818_s16 = smov %s820_s20  ;;  %18 = sbr.rel (!%p16_p5) target bundleno = 6 (0x6), region = 88 }
 0x111   :  { %352 = vsyncpa [#allocation4], 1 }
 0x112   :  { %354 = vsyncpa [#allocation4 + $0x1], 1 }
 0x113   :  { %355 = vsyncpa [#allocation5], 1 }
 0x114   :  { %357 = vsyncpa [#allocation5 + $0x1], 1 }

</bundles_post_ra>
